<compile_context>
chip_gen: v6e
topology: v6e:2x2x1
jax: 0.10.0
libtpu: 0.0.40
codegen_flags: <defaults>
</compile_context>

<pallas_src>
from functools import partial

import jax
import jax.numpy as jnp
from jax.experimental import pallas as pl
from jax.experimental.pallas import tpu as pltpu


LANE = 128                 # TPU lane width
MAX_TILE_B = 4096          # max batch columns per grid step
MIN_PARALLEL_TILES = 4     # keep >= 4 tiles for big batches (v7x has 2 TensorCores)

_ACTIVATIONS = {
    "relu": lambda t: jnp.maximum(t, 0.0),
    "tanh": jnp.tanh,
    "sigmoid": jax.nn.sigmoid,
}
# The torch module silently skips unrecognised names (identity); we accept the
# obvious identity spellings but raise on anything else to catch typos.
_IDENTITY_NAMES = (None, "", "linear", "identity", "none")


def make_mlp_kernel(activation_functions):
    """Fused batch-on-lanes MLP kernel for a static tuple of hidden activations."""
    n_hidden = len(activation_functions)

    def kernel(*refs):
        xT_ref, o_ref = refs[0], refs[-1]
        param_refs = refs[1:-1]            # w1, b1, ..., w_out(8 rows), b_out

        hT = xT_ref[...]                   # (F, TILE_B) f32, batch on lanes

        for layer in range(n_hidden):
            w = param_refs[2 * layer][...]         # (H_out, H_in) bf16
            b = param_refs[2 * layer + 1][...]     # (H_out, 1)   f32
            # bf16 MXU matmul with f32 accumulation; cast happens in-kernel.
            hT = jnp.dot(w, hT.astype(w.dtype), preferred_element_type=jnp.float32)
            hT = hT + b                            # lane-dense f32 epilogue
            act = _ACTIVATIONS.get(activation_functions[layer])
            if act is not None:
                hT = act(hT)

        # Output layer: weight padded to 8 sublane rows (rows 1..7 are zero) so
        # the LHS is a native sublane tile; row 0 of the result is the
        # lane-dense prediction row for this tile.
        w_out = param_refs[2 * n_hidden][...]      # (8, H_last) bf16
        b_out = param_refs[2 * n_hidden + 1][...]  # (1, 1) f32
        res = jnp.dot(w_out, hT.astype(w_out.dtype), preferred_element_type=jnp.float32)
        o_ref[...] = res[0:1, :] + b_out           # (1, TILE_B), unmasked lane-dense store

    return kernel


def _choose_tiling(batch):
    """Pick (num_tiles, tile_b): tiles <= MAX_TILE_B, >= MIN_PARALLEL_TILES tiles
    for large batches, tile_b a multiple of 128, minimal padding."""
    num_tiles = pl.cdiv(batch, MAX_TILE_B)
    if batch >= MIN_PARALLEL_TILES * 1024:
        num_tiles = max(num_tiles, MIN_PARALLEL_TILES)
    tile_b = pl.cdiv(batch, num_tiles)
    tile_b = pl.cdiv(tile_b, LANE) * LANE
    num_tiles = pl.cdiv(batch, tile_b)
    return num_tiles, tile_b


@partial(jax.jit, static_argnames=("activation_functions",))
def net_forward(x, params, activation_functions):
    """Forward pass of `Net`.

    x: (B, F) float32.
    params: (w1, b1, ..., w_out, b_out) with torch layouts: w (out, in), b (out,).
    Returns (B, 1) float32 predictions.
    """
    n_hidden = len(activation_functions)
    assert len(params) == 2 * (n_hidden + 1)
    for name in activation_functions:
        if name not in _ACTIVATIONS and name not in _IDENTITY_NAMES:
            raise ValueError(f"unknown activation {name!r}; expected one of "
                             f"{tuple(_ACTIVATIONS)} or an identity name")

    B, F = x.shape
    num_tiles, tile_b = _choose_tiling(B)
    Bp = num_tiles * tile_b

    # Single cheap wrapper pass: transpose to batch-on-lanes (+ tail pad).
    xT = x.T                                     # (F, B) f32
    if Bp != B:
        xT = jnp.pad(xT, ((0, 0), (0, Bp - B)))  # fuses with the transpose

    kernel_args = [xT]
    in_specs = [pl.BlockSpec((F, tile_b), lambda i: (0, i))]

    flops = 0
    transcendentals = 0
    param_bytes = 0
    for layer in range(n_hidden + 1):
        w = params[2 * layer]                    # (out, in) torch layout
        b = params[2 * layer + 1]                # (out,)
        out_dim, in_dim = int(w.shape[0]), int(w.shape[1])
        flops += 2 * Bp * out_dim * in_dim
        if layer < n_hidden and activation_functions[layer] in ("tanh", "sigmoid"):
            transcendentals += Bp * out_dim
        param_bytes += 2 * out_dim * in_dim + 4 * out_dim

        w_bf = w.astype(jnp.bfloat16)
        if layer == n_hidden:
            # Pad the (1, H_last) output weight to 8 sublane rows (rows 1..7 zero).
            w_bf = jnp.pad(w_bf, ((0, 8 - w_bf.shape[0]), (0, 0)))
        b_col = b.reshape(-1, 1).astype(jnp.float32)

        kernel_args += [w_bf, b_col]
        in_specs += [
            pl.BlockSpec(tuple(w_bf.shape), lambda i: (0, 0)),   # VMEM-resident
            pl.BlockSpec(tuple(b_col.shape), lambda i: (0, 0)),  # VMEM-resident
        ]

    bytes_accessed = Bp * F * 4 + Bp * 4 + param_bytes

    out = pl.pallas_call(
        make_mlp_kernel(activation_functions),
        out_shape=jax.ShapeDtypeStruct((1, Bp), jnp.float32),
        grid=(num_tiles,),
        in_specs=in_specs,
        out_specs=pl.BlockSpec((1, tile_b), lambda i: (0, i)),
        compiler_params=pltpu.CompilerParams(dimension_semantics=("parallel",)),
        cost_estimate=pl.CostEstimate(
            flops=flops, transcendentals=transcendentals, bytes_accessed=bytes_accessed
        ),
    )(*kernel_args)

    return out[0, :B].reshape(B, 1)


def init_params(key, input_size, list_layers):
    """Deterministic init mimicking torch.nn.Linear defaults, torch layouts:
    weight (out, in), bias (out,), both U(-1/sqrt(fan_in), 1/sqrt(fan_in))."""
    dims = [input_size] + list(list_layers) + [1]
    params = []
    for fan_in, fan_out in zip(dims[:-1], dims[1:]):
        key, kw, kb = jax.random.split(key, 3)
        bound = 1.0 / float(fan_in) ** 0.5
        w = jax.random.uniform(kw, (fan_out, fan_in), jnp.float32, -bound, bound)
        b = jax.random.uniform(kb, (fan_out,), jnp.float32, -bound, bound)
        params.extend([w, b])
    return tuple(params)


def ref_forward(x, params, activation_functions):
    """Pure-JAX reference with the same bf16-operand / f32-accumulate precision."""
    n_hidden = len(activation_functions)
    h = x
    for layer in range(n_hidden):
        w, b = params[2 * layer], params[2 * layer + 1]
        h = jnp.dot(h.astype(jnp.bfloat16), w.T.astype(jnp.bfloat16),
                    preferred_element_type=jnp.float32) + b
        act = _ACTIVATIONS.get(activation_functions[layer])
        if act is not None:
            h = act(h)
    w, b = params[-2], params[-1]
    return jnp.dot(h.astype(jnp.bfloat16), w.T.astype(jnp.bfloat16),
                   preferred_element_type=jnp.float32) + b


if __name__ == "__main__":
    key = jax.random.PRNGKey(0)
    key, kx = jax.random.split(key)

    input_size = 16
    list_layers = (32, 32)
    activation_functions = ("relu", "tanh")
    batch = 4096                 # -> 4 tiles of 1024: exercises the parallel grid

    x = jax.random.normal(kx, (batch, input_size), dtype=jnp.float32)
    params = init_params(key, input_size, list_layers)

    out = jax.block_until_ready(net_forward(x, params, activation_functions))
    expected = ref_forward(x, params, activation_functions)
    assert out.shape == (batch, 1)
    assert jnp.allclose(out, expected, atol=1e-2, rtol=1e-2)

    # Ragged batch: only rounds up to the next multiple of 128 (384), single tile.
    out_small = jax.block_until_ready(net_forward(x[:300], params, activation_functions))
    assert out_small.shape == (300, 1)
    assert jnp.allclose(out_small, expected[:300], atol=1e-2, rtol=1e-2)

    print("KERNEL_OK")
</pallas_src>

<mosaic_0001>
module attributes {stable_mosaic.version = 11 : i64} {
  func.func @kernel(%arg0: i32, %arg1: memref<16x1024xf32, #tpu.memory_space<vmem>>, %arg2: memref<32x16xbf16, #tpu.memory_space<vmem>>, %arg3: memref<32x1xf32, #tpu.memory_space<vmem>>, %arg4: memref<32x32xbf16, #tpu.memory_space<vmem>>, %arg5: memref<32x1xf32, #tpu.memory_space<vmem>>, %arg6: memref<8x32xbf16, #tpu.memory_space<vmem>>, %arg7: memref<1x1xf32, #tpu.memory_space<vmem>>, %arg8: memref<1x1024xf32, #tpu.memory_space<vmem>>) attributes {dimension_semantics = [#tpu.dimension_semantics<parallel>], iteration_bounds = array<i64: 4>, scalar_prefetch = 0 : i64, scratch_operands = 0 : i64, tpu.core_type = #tpu.core_type<tc>, window_params = [{transform_indices = @transform_0, window_bounds = array<i64: 16, 1024>}, {pipeline_mode = #tpu.pipeline_mode<synchronous>, transform_indices = @transform_1, window_bounds = array<i64: 32, 16>}, {pipeline_mode = #tpu.pipeline_mode<synchronous>, transform_indices = @transform_2, window_bounds = array<i64: 32, 1>}, {pipeline_mode = #tpu.pipeline_mode<synchronous>, transform_indices = @transform_3, window_bounds = array<i64: 32, 32>}, {pipeline_mode = #tpu.pipeline_mode<synchronous>, transform_indices = @transform_4, window_bounds = array<i64: 32, 1>}, {pipeline_mode = #tpu.pipeline_mode<synchronous>, transform_indices = @transform_5, window_bounds = array<i64: 8, 32>}, {pipeline_mode = #tpu.pipeline_mode<synchronous>, transform_indices = @transform_6, window_bounds = array<i64: 1, 1>}, {transform_indices = @transform_7, window_bounds = array<i64: 1, 1024>}]} {
    %c0 = arith.constant 0 : index
    %c0_0 = arith.constant 0 : index
    %0 = vector.load %arg1[%c0, %c0_0] : memref<16x1024xf32, #tpu.memory_space<vmem>>, vector<16x1024xf32>
    %c0_1 = arith.constant 0 : index
    %c0_2 = arith.constant 0 : index
    %1 = vector.load %arg2[%c0_1, %c0_2] : memref<32x16xbf16, #tpu.memory_space<vmem>>, vector<32x16xbf16>
    %c0_3 = arith.constant 0 : index
    %c0_4 = arith.constant 0 : index
    %2 = vector.load %arg3[%c0_3, %c0_4] : memref<32x1xf32, #tpu.memory_space<vmem>>, vector<32x1xf32>
    %3 = arith.truncf %0 : vector<16x1024xf32> to vector<16x1024xbf16>
    %cst = arith.constant dense<0.000000e+00> : vector<32x1024xf32>
    %4 = tpu.matmul %1, %3, %cst {dimension_numbers = #tpu.dot_dimension_numbers<[1], [0], [0], [1], [0, 0, 1, 1], [], []>} : vector<32x16xbf16>, vector<16x1024xbf16>, vector<32x1024xf32> -> vector<32x1024xf32>
    %5 = vector.broadcast %2 : vector<32x1xf32> to vector<32x1024xf32>
    %6 = arith.addf %4, %5 : vector<32x1024xf32>
    %cst_5 = arith.constant 0.000000e+00 : f32
    %7 = vector.broadcast %cst_5 : f32 to vector<32x1024xf32>
    %8 = arith.maximumf %6, %7 : vector<32x1024xf32>
    %c0_6 = arith.constant 0 : index
    %c0_7 = arith.constant 0 : index
    %9 = vector.load %arg4[%c0_6, %c0_7] : memref<32x32xbf16, #tpu.memory_space<vmem>>, vector<32x32xbf16>
    %c0_8 = arith.constant 0 : index
    %c0_9 = arith.constant 0 : index
    %10 = vector.load %arg5[%c0_8, %c0_9] : memref<32x1xf32, #tpu.memory_space<vmem>>, vector<32x1xf32>
    %11 = arith.truncf %8 : vector<32x1024xf32> to vector<32x1024xbf16>
    %cst_10 = arith.constant dense<0.000000e+00> : vector<32x1024xf32>
    %12 = tpu.matmul %9, %11, %cst_10 {dimension_numbers = #tpu.dot_dimension_numbers<[1], [0], [0], [1], [0, 0, 1, 1], [], []>} : vector<32x32xbf16>, vector<32x1024xbf16>, vector<32x1024xf32> -> vector<32x1024xf32>
    %13 = vector.broadcast %10 : vector<32x1xf32> to vector<32x1024xf32>
    %14 = arith.addf %12, %13 : vector<32x1024xf32>
    %15 = math.tanh %14 : vector<32x1024xf32>
    %c0_11 = arith.constant 0 : index
    %c0_12 = arith.constant 0 : index
    %16 = vector.load %arg6[%c0_11, %c0_12] : memref<8x32xbf16, #tpu.memory_space<vmem>>, vector<8x32xbf16>
    %c0_13 = arith.constant 0 : index
    %c0_14 = arith.constant 0 : index
    %17 = vector.load %arg7[%c0_13, %c0_14] : memref<1x1xf32, #tpu.memory_space<vmem>>, vector<1x1xf32>
    %18 = arith.truncf %15 : vector<32x1024xf32> to vector<32x1024xbf16>
    %cst_15 = arith.constant dense<0.000000e+00> : vector<8x1024xf32>
    %19 = tpu.matmul %16, %18, %cst_15 {dimension_numbers = #tpu.dot_dimension_numbers<[1], [0], [0], [1], [0, 0, 1, 1], [], []>} : vector<8x32xbf16>, vector<32x1024xbf16>, vector<8x1024xf32> -> vector<8x1024xf32>
    %20 = vector.extract_strided_slice %19 {offsets = [0, 0], sizes = [1, 1024], strides = [1, 1]} : vector<8x1024xf32> to vector<1x1024xf32>
    %21 = vector.broadcast %17 : vector<1x1xf32> to vector<1x1024xf32>
    %22 = arith.addf %20, %21 : vector<1x1024xf32>
    %c0_16 = arith.constant 0 : index
    %c0_17 = arith.constant 0 : index
    %23 = vector.load %arg8[%c0_16, %c0_17] : memref<1x1024xf32, #tpu.memory_space<vmem>>, vector<1x1024xf32>
    tpu.vector_store %arg8[%c0_16, %c0_17], %22 {strides = array<i32>} : memref<1x1024xf32, #tpu.memory_space<vmem>>, vector<1x1024xf32>,
    return
  }
  func.func @transform_0(%arg0: i32) -> (i32, i32) {
    %c0_i32 = arith.constant 0 : i32
    %c0_i32_0 = arith.constant 0 : i32
    return %c0_i32, %arg0 : i32, i32
  }
  func.func @transform_1(%arg0: i32) -> (i32, i32) {
    %c0_i32 = arith.constant 0 : i32
    %c0_i32_0 = arith.constant 0 : i32
    %c0_i32_1 = arith.constant 0 : i32
    return %c0_i32, %c0_i32_0 : i32, i32
  }
  func.func @transform_2(%arg0: i32) -> (i32, i32) {
    %c0_i32 = arith.constant 0 : i32
    %c0_i32_0 = arith.constant 0 : i32
    %c0_i32_1 = arith.constant 0 : i32
    return %c0_i32, %c0_i32_0 : i32, i32
  }
  func.func @transform_3(%arg0: i32) -> (i32, i32) {
    %c0_i32 = arith.constant 0 : i32
    %c0_i32_0 = arith.constant 0 : i32
    %c0_i32_1 = arith.constant 0 : i32
    return %c0_i32, %c0_i32_0 : i32, i32
  }
  func.func @transform_4(%arg0: i32) -> (i32, i32) {
    %c0_i32 = arith.constant 0 : i32
    %c0_i32_0 = arith.constant 0 : i32
    %c0_i32_1 = arith.constant 0 : i32
    return %c0_i32, %c0_i32_0 : i32, i32
  }
  func.func @transform_5(%arg0: i32) -> (i32, i32) {
    %c0_i32 = arith.constant 0 : i32
    %c0_i32_0 = arith.constant 0 : i32
    %c0_i32_1 = arith.constant 0 : i32
    return %c0_i32, %c0_i32_0 : i32, i32
  }
  func.func @transform_6(%arg0: i32) -> (i32, i32) {
    %c0_i32 = arith.constant 0 : i32
    %c0_i32_0 = arith.constant 0 : i32
    %c0_i32_1 = arith.constant 0 : i32
    return %c0_i32, %c0_i32_0 : i32, i32
  }
  func.func @transform_7(%arg0: i32) -> (i32, i32) {
    %c0_i32 = arith.constant 0 : i32
    %c0_i32_0 = arith.constant 0 : i32
    return %c0_i32, %arg0 : i32, i32
  }
}

</mosaic_0001>

<bundles_post_ra>
// kernel: net_forward.1
= control target key start
LH: loop header
LB: loop body
LE: loop exit
PB: predicated region body
PF: predicated region fallthrough
CT: control target
= control target key end

     0   :  { %s1912_s0 = inlined_call_operand.hbm [shape: f32[16,4096], index: 0, kind: input, shape index: {}]   ;;  %s1913_s1 = inlined_call_operand.vmem [shape: bf16[32,16], index: 1, kind: input, shape index: {}]   ;;  %s1914_s2 = inlined_call_operand.vmem [shape: f32[32,1], index: 2, kind: input, shape index: {}]   ;;  %s1915_s3 = inlined_call_operand.vmem [shape: bf16[32,32], index: 3, kind: input, shape index: {}]   ;;  %s1916_s4 = inlined_call_operand.vmem [shape: f32[32,1], index: 4, kind: input, shape index: {}]   ;;  %s1917_s5 = inlined_call_operand.vmem [shape: bf16[8,32], index: 5, kind: input, shape index: {}]   ;;  %s1918_s6 = inlined_call_operand.<no memory space> [shape: f32[1,1], index: 6, kind: input, shape index: {}]   ;;  %s1919_s7 = inlined_call_operand.hbm [shape: f32[1,4096], index: 7, kind: output, shape index: {}]  }
   0x1   :  { %v12_v0 = vstv %s1918_s6 }
   0x2   :  { %13 = vst [vmem:[#allocation2] sm:$0x1] %v12_v0 }
   0x3   :  { %14 = vsyncpa [#allocation4], 0 }
   0x4   :  { %16 = vsyncpa [#allocation4 + $0x1], 0 }
   0x5   :  { %17 = vsyncpa [#allocation5], 0 }
   0x6   :  { %19 = vsyncpa [#allocation5 + $0x1], 0  ;;  %s1571_s26 = smov 0   ;;  %s1573_s27 = smov 0  }
   0x7   :  { %s1575_s28 = smov 0   ;;  %s1577_s29 = smov 0  }
   0x8 LB: > { %s1592_s6 = sadd.s32 4294967295, %s1519_s29   ;;  %s1266_s30 = sadd.s32 4294967294, %s1519_s29   ;;  %s1519_s29 = sphi %s1577_s29, %s1934_s29   ;;  %s1515_s28 = sphi %s1575_s28, %s1933_s28   ;;  %s1511_s27 = sphi %s1573_s27, %s1932_s27   ;;  %s1507_s26 = sphi %s1571_s26, %s1931_s26  }
   0x9   : > { %s1596_s8 = sadd.s32 1, %s1519_s29   ;;  %s32_s9 = sadd.s32 1, %s1515_s28 }
   0xa   : > { %s29_s10 = ssub.s32 %s1519_s29, %s1596_s8  ;;  %p39_p0 = scmp.ne.s32.totalorder %s1515_s28, %s1511_s27 }
   0xb   : > { %p30_p1 = scmp.eq.s32.totalorder %s29_s10, 0  ;;  %p40_p2 = scmp.eq.s32.totalorder %s1519_s29, 0 }
   0xc   : > { %p45_p3 = scmp.ne.s32.totalorder %s1511_s27, %s1507_s26  ;;  %p46_p4 = scmp.eq.s32.totalorder %s1592_s6, 0 }
   0xd   : > { %s1608_s11 = scalar_select %p30_p1, %s1515_s28, %s32_s9  }
   0xe   : > { %p1610_p5 = por %p40_p2, %p39_p0  ;;  %p1614_p6 = por %p46_p4, %p45_p3 }
   0xf   : > { %p195_p7 = scmp.eq.s32.totalorder %s1592_s6, 3  ;;  %p201_p8 = scmp.eq.s32.totalorder %s1266_s30, 3 }
  0x10   : > { %s1923_s13 = scalar_select %p1614_p6, 1, 0 }
  0x11   : > { %p1318_p9 = scmp.lt.s32.totalorder %s1519_s29, 4  ;;  %p1620_p10 = por %p195_p7, %p39_p0 }
  0x12   : > { %p1624_p11 = por %p201_p8, %p45_p3  ;;  %s239_s16 = sand.u32 1, %s1515_s28  }
  0x13   : > { %s1924_s14 = scalar_select %p1620_p10, 1, 0 }
  0x14   : > { %s1925_s15 = scalar_select %p1624_p11, 1, 0 }
  0x15   : > { %s1304_s17 = sshll.u32 %s1519_s29, 10  ;;  %s1269_s18 = sshll.u32 %s239_s16, 7 }
  0x16   : > { %s1633_s21 = scalar_lea.hbm %s1912_s0, %s1304_s17  ;;  %s243_s22 = scalar_lea.vmem [#allocation3], %s1269_s18 }
  0x17   : > { %s250_s23 = sshll.u32 %s243_s22, 4  ;;  %p1637_p12 = pnand %p1318_p9, %p1610_p5  ;;  %s1641_s23 = int_to_ptr.vmem [resolvable:$true] %s250_s23 }
  0x18   : > { %s1644_s25 = scalar_lea.sflag [#allocation4], %s239_s16  ;;  %s1427_s30 = scalar_lea.hbm %s1633_s21, 2048 }
  0x19   : > { %p1428_p0 = scmp.ne.s32.totalorder %s1633_s21, %s1427_s30  ;;  %p1429_p1 = pneg %p1637_p12 }
  0x1a   : > { %s1432_s12 = scalar_lea.hbm %s1912_s0, 8192  ;;  %p1433_p4 = scmp.lt.s32.totalorder %s1633_s21, %s1912_s0 }
  0x1b   : > { %p1430_p2 = pnand %p1429_p1, %p1428_p0  ;;  %p1434_p5 = scmp.lt.s32.totalorder %s1432_s12, %s1427_s30 }
  0x1d   : > { %p1431_p3 = pneg %p1430_p2  ;;  %p1435_p7 = por %p1434_p5, %p1433_p4 }
  0x1f   : > { %p1436_p8 = pnand %p1435_p7, %p1431_p3 }
  0x21   : > { %1439 = shalt.err (!%p1436_p8)
}
  0x22   : > { %s1440_s16 = scalar_lea.vmem %s1641_s23, 2048  ;;  %s1521_s19 = smov [#allocation3]  }
  0x23   : > { %p1441_p9 = scmp.ne.s32.totalorder %s1641_s23, %s1440_s16  ;;  %s1445_s20 = sshll.u32 %s1521_s19, 4  ;;  %s1446_s20 = int_to_ptr.vmem [resolvable:$false] %s1445_s20 }
  0x24   : > { %s1447_s22 = scalar_lea.vmem %s1446_s20, 4096  ;;  %p1448_p2 = scmp.lt.s32.totalorder %s1641_s23, %s1446_s20 }
  0x25   : > { %p1443_p13 = pnand %p1441_p9, %p1429_p1  ;;  %p1449_p11 = scmp.lt.s32.totalorder %s1447_s22, %s1440_s16 }
  0x27   : > { %p1444_p0 = pneg %p1443_p13  ;;  %p1450_p10 = por %p1449_p11, %p1448_p2 }
  0x29   : > { %p1451_p6 = pnand %p1450_p10, %p1444_p0 }
  0x2b   : > { %1454 = shalt.err (!%p1451_p6)
}
  0x2c   : > { %s1522_s30 = smov 4096   ;;  %s1523_s9 = smov 1024  }
  0x2d   : > { %s1524_s10 = smov 64   ;;  %p258_p13 = scmp.lt.s32.totalorder %s1519_s29, 5 }
  0x2e   : > { %1313 = dma.hbm_to_vmem [thread:$0]  (!%p1637_p12), %s1633_s21, 2048, %s1641_s23, %s1644_s25, %s1522_s30, %s1523_s9, %s1524_s10  }
  0x2f   : > { %p1927_p1 = scmp.ge.s32.totalorder %s1519_s29, 1 }
  0x31   : > { %p259_p3 = pnand %p1927_p1, %p258_p13 }
  0x32   : > { %s1669_s12 = sand.u32 (!%p259_p3), 1, %s1511_s27   ;;  %p1928_p6 = scmp.ne.s32.totalorder (!%p259_p3), %s1923_s13, 0 }
  0x33   : > { %262 = sbr.rel (%p259_p3) target bundleno = 757 (0x2f5), region = 48  ;;  %s1273_s17 = sshll.u32 (!%p259_p3), %s1669_s12, 7 }
  0x34   : > { %s265_s18 = scalar_lea.sflag (!%p259_p3), [#allocation4], %s1669_s12  ;;  %s1673_s16 = scalar_lea.vmem (!%p259_p3), [#allocation3], %s1273_s17 }
  0x38   : > { %1498 = dma.done.wait (%p1928_p6), %s265_s18, 2048  }
  0x39   : > { %1500 = vsyncadd (%p1928_p6), %s265_s18, 4294965248  ;;  %v1525_v1 = vmov 0   ;;  %v303_v2 = vld [vmem:[%s1673_s16 + $0x8] sm:$0xff]  ;;  %v305_v4 = vld [vmem:[%s1673_s16 + $0x18] sm:$0xff]  ;;  %vm364_vm0 = vcmask 130048   ;;  %vm669_vm1 = vcmask 261120  }
  0x3a   : > { %403 = vmatprep.mubr.bf16.mxu0 %v1525_v1  ;;  %456 = vmatprep.mubr.bf16.mxu1 %v1525_v1  ;;  %v311_v3 = vld [vmem:[%s1673_s16 + $0x48] sm:$0xff]  ;;  %v313_v6 = vld [vmem:[%s1673_s16 + $0x58] sm:$0xff]  ;;  %v302_v7 = vld [vmem:[%s1673_s16] sm:$0xff]  ;;  %s1274_s18 = sshll.u32 %s1669_s12, 3  ;;  %s1182_s19 = scalar_lea.sflag [#allocation5], %s1669_s12 }
  0x3b   : > { %1357 = vset.pattern.permute.xlu0 %v1525_v1  ;;  %1358 = vset.pattern.permute.xlu1 %v1525_v1  ;;  %v327_v5 = vpack.c.bf16 %v311_v3, %v303_v2  ;;  %v310_v8 = vld [vmem:[%s1673_s16 + $0x40] sm:$0xff]  ;;  %v329_v9 = vpack.c.bf16 %v313_v6, %v305_v4  ;;  %v304_v11 = vld [vmem:[%s1673_s16 + $0x10] sm:$0xff]  ;;  %v307_v15 = vld [vmem:[%s1673_s16 + $0x28] sm:$0xff]  ;;  %s298_s13 = scalar_lea.vmem [#allocation6], %s1274_s18  ;;  %p1929_p11 = scmp.ne.s32.totalorder %s1924_s14, 0 }
  0x3c   : > { %v326_v10 = vpack.c.bf16 %v310_v8, %v302_v7  ;;  %v312_v12 = vld [vmem:[%s1673_s16 + $0x50] sm:$0xff]  ;;  %v1359_v14 = vld [vmem:[%s1913_s1] sm:$0xff]   ;;  %v315_v16 = vld [vmem:[%s1673_s16 + $0x68] sm:$0xff]  ;;  %s1196_s21 = sshll.u32 %s298_s13, 4  ;;  %s1527_s22 = smov [#allocation6]   ;;  %s1197_s21 = int_to_ptr.vmem [resolvable:$true] %s1196_s21 }
  0x3d   : > { %385 = vmatprep.subr.bf16.mxu0 %v327_v5  ;;  %v328_v13 = vpack.c.bf16 %v312_v12, %v304_v11  ;;  %438 = vmatprep.subr.bf16.mxu1 %v329_v9  ;;  %v309_v17 = vld [vmem:[%s1673_s16 + $0x38] sm:$0xff]  ;;  %v331_v19 = vpack.c.bf16 %v315_v16, %v307_v15  ;;  %v306_v21 = vld [vmem:[%s1673_s16 + $0x20] sm:$0xff]  ;;  %v308_v23 = vld [vmem:[%s1673_s16 + $0x30] sm:$0xff]  ;;  %s1455_s20 = scalar_lea.vmem %s1197_s21, 128  ;;  %s1459_s30 = sshll.u32 %s1527_s22, 4  ;;  %s1460_s30 = int_to_ptr.vmem [resolvable:$false] %s1459_s30 }
  0x3e   : > { %386 = vmatpush1.bf16.msra.mxu0 %v326_v10  ;;  %v317_v18 = vld [vmem:[%s1673_s16 + $0x78] sm:$0xff]  ;;  %v314_v22 = vld [vmem:[%s1673_s16 + $0x60] sm:$0xff]  ;;  %v316_v25 = vld [vmem:[%s1673_s16 + $0x70] sm:$0xff]  ;;  %s1305_s16 = sshll.u32 %s1592_s6, 7  ;;  %p1456_p10 = scmp.ne.s32.totalorder %s1197_s21, %s1455_s20 }
  0x3f   : > { %439 = vmatpush1.bf16.msra.mxu1 %v328_v13  ;;  %v333_v20 = vpack.c.bf16 %v317_v18, %v309_v17  ;;  %v330_v24 = vpack.c.bf16 %v314_v22, %v306_v21  ;;  %v332_v26 = vpack.c.bf16 %v316_v25, %v308_v23  ;;  %v324_v27 = vld [vmem:[%s1914_s2 + $0x10] sm:$0xff]  ;;  %491 = vmatprep.subr.bf16.mxu0 %v331_v19  ;;  %v322_v28 = vld [vmem:[%s1914_s2] sm:$0xff]  ;;  %v1360_v29 = vld [vmem:[%s1913_s1 + $0x8] sm:$0xff]   ;;  %s1194_s25 = scalar_lea.hbm %s1919_s7, %s1305_s16  ;;  %s1461_s6 = scalar_lea.vmem %s1460_s30, 256 }
  0x40   : > { %346 = vperm.xlu0 %1357, %v324_v27   ;;  %v325_v30 = vld [vmem:[%s1914_s2 + $0x18] sm:$0xff]  ;;  %336 = vperm.xlu1 %1358, %v322_v28   ;;  %v323_v31 = vld [vmem:[%s1914_s2 + $0x8] sm:$0xff]  ;;  %v621_v32 = vld [vmem:[%s1916_s4 + $0x10] sm:$0xff]  ;;  %p1457_p12 = pnand %p1456_p10, %p1929_p11  ;;  %p1462_p5 = scmp.lt.s32.totalorder %s1197_s21, %s1460_s30 }
  0x41   : > { %1277 = vmatmul.mubr.msk.bf16.vlgmr.msra.gmra.mxu0 %vm364_vm0, %v1359_v14  ;;  %544 = vmatprep.subr.bf16.mxu1 %v333_v20  ;;  %v622_v33 = vld [vmem:[%s1916_s4 + $0x18] sm:$0xff]  ;;  %v619_v34 = vld [vmem:[%s1916_s4] sm:$0xff]  ;;  %v620_v35 = vld [vmem:[%s1916_s4 + $0x8] sm:$0xff]  ;;  %p1463_p7 = scmp.lt.s32.totalorder %s1461_s6, %s1455_s20 }
  0x42   : > { %1279 = vmatmul.mubr.msk.bf16.vlgmr.msra.gmra.mxu1 %vm364_vm0, %v1359_v14  ;;  %413 = vmatprep.mubr.bf16.mxu0 %v1525_v1  ;;  %v921_v36 = vld [vmem:[#allocation2] sm:$0x1]  ;;  %p1458_p4 = pneg %p1457_p12 }
  0x43   : > { %466 = vmatprep.mubr.bf16.mxu1 %v1525_v1  ;;  %492 = vmatpush1.bf16.msra.mxu0 %v330_v24  ;;  %p1464_p8 = por %p1463_p7, %p1462_p5 }
  0x44   : > { %545 = vmatpush1.bf16.msra.mxu1 %v332_v26  ;;  %351 = vperm.xlu0 %1357, %v325_v30  }
  0x45   : > { %341 = vperm.xlu1 %1358, %v323_v31   ;;  %p1465_p9 = pnand %p1464_p8, %p1458_p4 }
  0x48   : > { %651 = vperm.xlu0 %1357, %v621_v32  }
  0x49   : > { %1278 = vmatmul.mubr.msk.bf16.gmra.mxu0 %vm364_vm0, %v1360_v29  ;;  %656 = vperm.xlu1 %1358, %v622_v33  }
  0x4a   : > { %1280 = vmatmul.mubr.msk.bf16.gmra.mxu1 %vm364_vm0, %v1360_v29  ;;  %509 = vmatprep.mubr.bf16.mxu0 %v1525_v1 }
  0x4b   : > { %562 = vmatprep.mubr.bf16.mxu1 %v1525_v1 }
  0x4c   : > { %641 = vperm.xlu0 %1357, %v619_v34  }
  0x4d   : > { %646 = vperm.xlu1 %1358, %v620_v35  }
  0x50   : > { %1107 = vperm.xlu0 %1357, %v921_v36  }
  0x51   : > { %1281 = vmatmul.mubr.msk.bf16.vlgmr.msra.gmra.mxu0 %vm364_vm0, %v1359_v14 }
  0x52   : > { %1283 = vmatmul.mubr.msk.bf16.vlgmr.msra.gmra.mxu1 %vm364_vm0, %v1359_v14  ;;  %519 = vmatprep.mubr.bf16.mxu0 %v1525_v1 }
  0x53   : > { %572 = vmatprep.mubr.bf16.mxu1 %v1525_v1 }
  0x59   : > { %1282 = vmatmul.mubr.msk.bf16.gmra.mxu0 %vm364_vm0, %v1360_v29 }
  0x5a   : > { %1284 = vmatmul.mubr.msk.bf16.gmra.mxu1 %vm364_vm0, %v1360_v29  ;;  %708 = vmatprep.mubr.bf16.mxu0 %v1525_v1 }
  0x5b   : > { %761 = vmatprep.mubr.bf16.mxu1 %v1525_v1 }
  0xbb   : > { %v1745_v42 = vpop.permute.xlu0 %346  ;;  %v1747_v44 = vpop.permute.xlu1 %336 }
  0xbf   : > { %v1749_v50 = vpop.permute.xlu0 %351 }
  0xc0   : > { %v1751_v52 = vpop.permute.xlu1 %341 }
 0x101   : > { %v405_v37 = vpop.f32.mrf.mxu0 }
 0x102   : > { %v458_v38 = vpop.f32.mrf.mxu1  ;;  %v406_v54 = vadd.f32 %v405_v37, %v1747_v44 }
 0x103   : > { %v407_v39 = vpop.f32.mrf.mxu0  ;;  %v459_v21 = vadd.f32 %v458_v38, %v1747_v44 }
 0x104   : > { %v460_v40 = vpop.f32.mrf.mxu1  ;;  %v408_v0 = vadd.f32 %v407_v39, %v1747_v44  ;;  %v583_v35 = vmax.f32 %v406_v54, 0.0 }
 0x105   : > { %v409_v41 = vpop.f32.mrf.mxu0  ;;  %v461_v2 = vadd.f32 %v460_v40, %v1747_v44  ;;  %v585_v38 = vmax.f32 %v459_v21, 0.0 }
 0x106   : > { %v462_v43 = vpop.f32.mrf.mxu1  ;;  %v410_v6 = vadd.f32 %v409_v41, %v1751_v52  ;;  %v584_v22 = vmax.f32 %v408_v0, 0.0 }
 0x107   : > { %v411_v45 = vpop.f32.mrf.mxu0  ;;  %v463_v7 = vadd.f32 %v462_v43, %v1751_v52  ;;  %v586_v26 = vmax.f32 %v461_v2, 0.0 }
 0x108   : > { %v464_v46 = vpop.f32.mrf.mxu1  ;;  %v412_v55 = vadd.f32 %v411_v45, %v1751_v52  ;;  %v591_v27 = vmax.f32 %v410_v6, 0.0 }
 0x109   : > { %v415_v47 = vpop.f32.mrf.mxu0  ;;  %v465_v59 = vadd.f32 %v464_v46, %v1751_v52  ;;  %v593_v31 = vmax.f32 %v463_v7, 0.0  ;;  %v1774_v46 = vld [vmem:[%s1915_s3] sm:$0xff]  }
 0x10a   : > { %v468_v48 = vpop.f32.mrf.mxu1  ;;  %v416_v60 = vadd.f32 %v415_v47, %v1745_v42  ;;  %v592_v11 = vmax.f32 %v412_v55, 0.0  ;;  %v623_v40 = vpack.c.bf16 %v591_v27, %v583_v35 }
 0x10b   : > { %v417_v49 = vpop.f32.mrf.mxu0  ;;  %v469_v3 = vadd.f32 %v468_v48, %v1745_v42  ;;  %v594_v16 = vmax.f32 %v465_v59, 0.0  ;;  %v625_v43 = vpack.c.bf16 %v593_v31, %v585_v38 }
 0x10c   : > { %v470_v51 = vpop.f32.mrf.mxu1  ;;  %v418_v56 = vadd.f32 %v417_v49, %v1745_v42  ;;  %v599_v17 = vmax.f32 %v416_v60, 0.0  ;;  %v624_v32 = vpack.c.bf16 %v592_v11, %v584_v22 }
 0x10d   : > { %v419_v53 = vpop.f32.mrf.mxu0  ;;  %v471_v61 = vadd.f32 %v470_v51, %v1745_v42  ;;  %v601_v23 = vmax.f32 %v469_v3, 0.0  ;;  %v626_v36 = vpack.c.bf16 %v594_v16, %v586_v26 }
 0x10e   : > { %v420_v57 = vadd.f32 %v419_v53, %v1749_v50  ;;  %v472_v58 = vpop.f32.mrf.mxu1  ;;  %v600_v12 = vmax.f32 %v418_v56, 0.0 }
 0x10f   : > { %v473_v62 = vadd.f32 %v472_v58, %v1749_v50  ;;  %v421_v63 = vpop.f32.mrf.mxu0  ;;  %v602_v18 = vmax.f32 %v471_v61, 0.0 }
 0x110   : > { %v422_v4 = vadd.f32 %v421_v63, %v1749_v50  ;;  %v474_v5 = vpop.f32.mrf.mxu1  ;;  %v607_v8 = vmax.f32 %v420_v57, 0.0 }
 0x111   : > { %v475_v9 = vadd.f32 %v474_v5, %v1749_v50  ;;  %v511_v10 = vpop.f32.mrf.mxu0  ;;  %v609_v13 = vmax.f32 %v473_v62, 0.0 }
 0x112   : > { %v608_v14 = vmax.f32 %v422_v4, 0.0  ;;  %v1768_v15 = vpop.f32.mrf.mxu1  ;;  %v631_v28 = vpack.c.bf16 %v607_v8, %v599_v17  ;;  %v512_v51 = vadd.f32 %v511_v10, %v1747_v44 }
 0x113   : > { %v610_v19 = vmax.f32 %v475_v9, 0.0  ;;  %v513_v20 = vpop.f32.mrf.mxu0  ;;  %v633_v33 = vpack.c.bf16 %v609_v13, %v601_v23  ;;  %v565_v16 = vadd.f32 %v1768_v15, %v1747_v44 }
 0x114   : > { %v632_v24 = vpack.c.bf16 %v608_v14, %v600_v12  ;;  %v566_v25 = vpop.f32.mrf.mxu1  ;;  %v514_v61 = vadd.f32 %v513_v20, %v1747_v44  ;;  %v587_v27 = vmax.f32 %v512_v51, 0.0 }
 0x115   : > { %v634_v29 = vpack.c.bf16 %v610_v19, %v602_v18  ;;  %v515_v30 = vpop.f32.mrf.mxu0  ;;  %v567_v3 = vadd.f32 %v566_v25, %v1747_v44  ;;  %v589_v44 = vmax.f32 %v565_v16, 0.0 }
 0x116   : > { %v568_v34 = vpop.f32.mrf.mxu1  ;;  %688 = vmatprep.subr.bf16.mxu0 %v632_v24  ;;  %v516_v4 = vadd.f32 %v515_v30, %v1751_v52  ;;  %v588_v19 = vmax.f32 %v514_v61, 0.0  ;;  %v1818_v30 = vpop.permute.xlu1 %656 }
 0x117   : > { %741 = vmatprep.subr.bf16.mxu1 %v634_v29  ;;  %v517_v37 = vpop.f32.mrf.mxu0  ;;  %689 = vmatpush1.bf16.msra.mxu0 %v631_v28  ;;  %v569_v5 = vadd.f32 %v568_v34, %v1751_v52  ;;  %v1816_v29 = vpop.permute.xlu0 %651 }
 0x118   : > { %v570_v39 = vpop.f32.mrf.mxu1  ;;  %742 = vmatpush1.bf16.msra.mxu1 %v633_v33  ;;  %690 = vmatprep.subr.bf16.mxu0 %v624_v32  ;;  %v518_v53 = vadd.f32 %v517_v37, %v1751_v52  ;;  %v595_v21 = vmax.f32 %v516_v4, 0.0 }
 0x119   : > { %743 = vmatprep.subr.bf16.mxu1 %v626_v36  ;;  %v521_v41 = vpop.f32.mrf.mxu0  ;;  %v571_v57 = vadd.f32 %v570_v39, %v1751_v52  ;;  %v597_v22 = vmax.f32 %v569_v5, 0.0 }
 0x11a   : > { %v574_v45 = vpop.f32.mrf.mxu1  ;;  %v522_v62 = vadd.f32 %v521_v41, %v1745_v42  ;;  %v596_v11 = vmax.f32 %v518_v53, 0.0  ;;  %v627_v15 = vpack.c.bf16 %v595_v21, %v587_v27 }
 0x11b   : > { %v523_v47 = vpop.f32.mrf.mxu0  ;;  %691 = vmatpush1.bf16.msra.mxu0 %v623_v40  ;;  %v575_v63 = vadd.f32 %v574_v45, %v1745_v42  ;;  %v598_v12 = vmax.f32 %v571_v57, 0.0  ;;  %v629_v28 = vpack.c.bf16 %v597_v22, %v589_v44  ;;  %v1820_v34 = vpop.permute.xlu0 %641 }
 0x11c   : > { %v576_v48 = vpop.f32.mrf.mxu1  ;;  %744 = vmatpush1.bf16.msra.mxu1 %v625_v43  ;;  %v524_v54 = vadd.f32 %v523_v47, %v1745_v42  ;;  %v603_v17 = vmax.f32 %v522_v62, 0.0  ;;  %v628_v25 = vpack.c.bf16 %v596_v11, %v588_v19  ;;  %v1824_v40 = vpop.permute.xlu1 %646 }
 0x11d   : > { %v525_v49 = vpop.f32.mrf.mxu0  ;;  %v577_v58 = vadd.f32 %v576_v48, %v1745_v42  ;;  %v1362_v42 = vld [vmem:[%s1915_s3 + $0x8] sm:$0xff]   ;;  %v605_v18 = vmax.f32 %v575_v63, 0.0 }
 0x11e   : > { %v526_v55 = vadd.f32 %v525_v49, %v1749_v50  ;;  %v578_v56 = vpop.f32.mrf.mxu1  ;;  %1287 = vmatmul.mubr.msk.bf16.vlgmr.msra.gmra.mxu0 %vm669_vm1, %v1774_v46  ;;  %v604_v7 = vmax.f32 %v524_v54, 0.0 }
 0x11f   : > { %v579_v59 = vadd.f32 %v578_v56, %v1749_v50  ;;  %1289 = vmatmul.mubr.msk.bf16.vlgmr.msra.gmra.mxu1 %vm669_vm1, %v1774_v46  ;;  %v527_v60 = vpop.f32.mrf.mxu0  ;;  %718 = vmatprep.mubr.bf16.mxu0 %v1525_v1  ;;  %v606_v13 = vmax.f32 %v577_v58, 0.0 }
 0x120   : > { %v528_v0 = vadd.f32 %v527_v60, %v1749_v50  ;;  %v580_v2 = vpop.f32.mrf.mxu1  ;;  %771 = vmatprep.mubr.bf16.mxu1 %v1525_v1  ;;  %v611_v8 = vmax.f32 %v526_v55, 0.0 }
 0x121   : > { %v581_v6 = vadd.f32 %v580_v2, %v1749_v50  ;;  %v613_v9 = vmax.f32 %v579_v59, 0.0  ;;  %v590_v50 = vmax.f32 %v567_v3, 0.0 }
 0x122   : > { %v612_v10 = vmax.f32 %v528_v0, 0.0  ;;  %v635_v23 = vpack.c.bf16 %v611_v8, %v603_v17 }
 0x123   : > { %v614_v14 = vmax.f32 %v581_v6, 0.0  ;;  %v637_v24 = vpack.c.bf16 %v613_v9, %v605_v18  ;;  %v630_v26 = vpack.c.bf16 %v598_v12, %v590_v50 }
 0x124   : > { %v636_v52 = vpack.c.bf16 %v612_v10, %v604_v7 }
 0x125   : > { %v638_v20 = vpack.c.bf16 %v614_v14, %v606_v13 }
 0x126   : > { %1288 = vmatmul.mubr.msk.bf16.gmra.mxu0 %vm669_vm1, %v1362_v42  ;;  %794 = vmatprep.subr.bf16.mxu0 %v636_v52 }
 0x127   : > { %1290 = vmatmul.mubr.msk.bf16.gmra.mxu1 %vm669_vm1, %v1362_v42  ;;  %847 = vmatprep.subr.bf16.mxu1 %v638_v20 }
 0x128   : > { %795 = vmatpush1.bf16.msra.mxu0 %v635_v23  ;;  %848 = vmatpush1.bf16.msra.mxu1 %v637_v24 }
 0x129   : > { %796 = vmatprep.subr.bf16.mxu0 %v628_v25  ;;  %849 = vmatprep.subr.bf16.mxu1 %v630_v26 }
 0x12a   : > { %814 = vmatprep.mubr.bf16.mxu0 %v1525_v1  ;;  %867 = vmatprep.mubr.bf16.mxu1 %v1525_v1 }
 0x12c   : > { %797 = vmatpush1.bf16.msra.mxu0 %v627_v15  ;;  %850 = vmatpush1.bf16.msra.mxu1 %v629_v28 }
 0x12f   : > { %1291 = vmatmul.mubr.msk.bf16.vlgmr.msra.gmra.mxu0 %vm669_vm1, %v1774_v46  ;;  %1293 = vmatmul.mubr.msk.bf16.vlgmr.msra.gmra.mxu1 %vm669_vm1, %v1774_v46 }
 0x130   : > { %824 = vmatprep.mubr.bf16.mxu0 %v1525_v1  ;;  %877 = vmatprep.mubr.bf16.mxu1 %v1525_v1 }
 0x137   : > { %1292 = vmatmul.mubr.msk.bf16.gmra.mxu0 %vm669_vm1, %v1362_v42  ;;  %1294 = vmatmul.mubr.msk.bf16.gmra.mxu1 %vm669_vm1, %v1362_v42 }
 0x138   : > { %973 = vmatprep.mubr.bf16.mxu0 %v1525_v1  ;;  %1014 = vmatprep.mubr.bf16.mxu1 %v1525_v1 }
 0x1de   : > { %v710_v31 = vpop.f32.mrf.mxu0 }
 0x1df   : > { %v763_v32 = vpop.f32.mrf.mxu1  ;;  %v711_v6 = vadd.f32 %v710_v31, %v1820_v34 }
 0x1e0   : > { %v712_v33 = vpop.f32.mrf.mxu0  ;;  %v764_v7 = vadd.f32 %v763_v32, %v1820_v34 }
 0x1e1   : > { %v765_v35 = vpop.f32.mrf.mxu1  ;;  %v713_v36 = vadd.f32 %v712_v33, %v1820_v34 }
 0x1e2   : > { %v714_v37 = vpop.f32.mrf.mxu0  ;;  %v766_v38 = vadd.f32 %v765_v35, %v1820_v34 }
 0x1e3   : > { %v767_v39 = vpop.f32.mrf.mxu1  ;;  %1363 = vtanh.f32 %v713_v36  ;;  %v715_v0 = vadd.f32 %v714_v37, %v1824_v40 }
 0x1e4   : > { %v716_v41 = vpop.f32.mrf.mxu0  ;;  %1365 = vtanh.f32 %v766_v38  ;;  %v768_v3 = vadd.f32 %v767_v39, %v1824_v40 }
 0x1e5   : > { %v717_v43 = vadd.f32 %v716_v41, %v1824_v40  ;;  %v769_v45 = vpop.f32.mrf.mxu1 }
 0x1e6   : > { %v770_v46 = vadd.f32 %v769_v45, %v1824_v40  ;;  %v720_v47 = vpop.f32.mrf.mxu0 }
 0x1e7   : > { %v721_v48 = vadd.f32 %v720_v47, %v1816_v29  ;;  %v773_v49 = vpop.f32.mrf.mxu1  ;;  %1367 = vtanh.f32 %v717_v43 }
 0x1e8   : > { %v722_v51 = vpop.f32.mrf.mxu0  ;;  %1369 = vtanh.f32 %v770_v46  ;;  %v774_v61 = vadd.f32 %v773_v49, %v1816_v29 }
 0x1e9   : > { %v723_v53 = vadd.f32 %v722_v51, %v1816_v29  ;;  %v775_v54 = vpop.f32.mrf.mxu1  ;;  %1371 = vtanh.f32 %v721_v48 }
 0x1ea   : > { %v776_v55 = vadd.f32 %v775_v54, %v1816_v29  ;;  %v724_v56 = vpop.f32.mrf.mxu0 }
 0x1eb   : > { %1373 = vtanh.f32 %v723_v53  ;;  %v725_v57 = vadd.f32 %v724_v56, %v1818_v30  ;;  %v777_v58 = vpop.f32.mrf.mxu1 }
 0x1ec   : > { %1375 = vtanh.f32 %v776_v55  ;;  %v778_v59 = vadd.f32 %v777_v58, %v1818_v30  ;;  %v726_v60 = vpop.f32.mrf.mxu0 }
 0x1ed   : > { %1377 = vtanh.f32 %v725_v57  ;;  %v727_v62 = vadd.f32 %v726_v60, %v1818_v30  ;;  %v779_v63 = vpop.f32.mrf.mxu1 }
 0x1ee   : > { %1379 = vtanh.f32 %v778_v59  ;;  %v780_v2 = vadd.f32 %v779_v63, %v1818_v30 }
 0x1ef   : > { %1381 = vtanh.f32 %v727_v62  ;;  %v1838_v4 = vpop.f32.mrf.mxu0  ;;  %v1840_v5 = vpop.f32.mrf.mxu1 }
 0x1f0   : > { %1383 = vtanh.f32 %v780_v2  ;;  %v1844_v10 = vpop.eup %1363 }
 0x1f1   : > { %1385 = vtanh.f32 %v774_v61  ;;  %v818_v8 = vpop.f32.mrf.mxu0  ;;  %v871_v9 = vpop.f32.mrf.mxu1  ;;  %v870_v61 = vadd.f32 %v1840_v5, %v1820_v34 }
 0x1f2   : > { %1387 = vtanh.f32 %v715_v0  ;;  %v819_v42 = vadd.f32 %v818_v8, %v1820_v34  ;;  %v1847_v13 = vpop.eup %1365  ;;  %v872_v14 = vadd.f32 %v871_v9, %v1820_v34  ;;  %v920_v0 = vld [vmem:[%s1917_s5] sm:$0xf] }
 0x1f3   : > { %1389 = vtanh.f32 %v768_v3  ;;  %v820_v11 = vpop.f32.mrf.mxu0  ;;  %v873_v12 = vpop.f32.mrf.mxu1 }
 0x1f4   : > { %1391 = vtanh.f32 %v711_v6  ;;  %v1368_v16 = vpop.eup %1367  ;;  %v821_v54 = vadd.f32 %v820_v11, %v1824_v40  ;;  %v874_v57 = vadd.f32 %v873_v12, %v1824_v40 }
 0x1f5   : > { %1393 = vtanh.f32 %v764_v7  ;;  %v822_v17 = vpop.f32.mrf.mxu0  ;;  %v875_v18 = vpop.f32.mrf.mxu1 }
 0x1f6   : > { %v1370_v52 = vpop.eup %1369  ;;  %v823_v19 = vadd.f32 %v822_v17, %v1824_v40  ;;  %v876_v50 = vadd.f32 %v875_v18, %v1824_v40  ;;  %1395 = vtanh.f32 %v819_v42 }
 0x1f7   : > { %v1372_v20 = vpop.eup %1371  ;;  %v826_v21 = vpop.f32.mrf.mxu0  ;;  %1397 = vtanh.f32 %v872_v14  ;;  %v925_v58 = vpack.c.bf16 %v1370_v52, %v1847_v13 }
 0x1f8   : > { %v879_v22 = vpop.f32.mrf.mxu1  ;;  %v1374_v23 = vpop.eup %1373  ;;  %v827_v24 = vadd.f32 %v826_v21, %v1816_v29  ;;  %1399 = vtanh.f32 %v823_v19  ;;  %v1110_v21 = vlaneseq }
 0x1f9   : > { %v1376_v25 = vpop.eup %1375  ;;  %v828_v26 = vpop.f32.mrf.mxu0  ;;  %1401 = vtanh.f32 %v876_v50  ;;  %v880_v39 = vadd.f32 %v879_v22, %v1816_v29 }
 0x1fa   : > { %v881_v27 = vpop.f32.mrf.mxu1  ;;  %v1378_v44 = vpop.eup %1377  ;;  %v829_v15 = vadd.f32 %v828_v26, %v1816_v29  ;;  %1403 = vtanh.f32 %v827_v24 }
 0x1fb   : > { %v882_v28 = vadd.f32 %v881_v27, %v1816_v29  ;;  %v1380_v31 = vpop.eup %1379  ;;  %v830_v32 = vpop.f32.mrf.mxu0  ;;  %v930_v46 = vpack.c.bf16 %v1378_v44, %v1372_v20  ;;  %v923_v29 = vpack.c.bf16 %v1368_v16, %v1844_v10 }
 0x1fc   : > { %v883_v33 = vpop.f32.mrf.mxu1  ;;  %v1382_v35 = vpop.eup %1381  ;;  %1405 = vtanh.f32 %v829_v15  ;;  %v831_v36 = vadd.f32 %v830_v32, %v1818_v30 }
 0x1fd   : > { %v884_v37 = vadd.f32 %v883_v33, %v1818_v30  ;;  %v1384_v38 = vpop.eup %1383  ;;  %1407 = vtanh.f32 %v882_v28  ;;  %v832_v41 = vpop.f32.mrf.mxu0  ;;  %v931_v45 = vpack.c.bf16 %v1382_v35, %v1374_v23  ;;  %v1526_v33 = vmov 1966171168  }
 0x1fe   : > { %v885_v43 = vpop.f32.mrf.mxu1  ;;  %v1386_v47 = vpop.eup %1385  ;;  %1409 = vtanh.f32 %v831_v36  ;;  %v833_v48 = vadd.f32 %v832_v41, %v1818_v30  ;;  %v933_v51 = vpack.c.bf16 %v1384_v38, %v1376_v25  ;;  %v1111_v25 = vshrl.u32 %v1110_v21, 7 }
 0x1ff   : > { %v886_v49 = vadd.f32 %v885_v43, %v1818_v30  ;;  %v1388_v53 = vpop.eup %1387  ;;  %1411 = vtanh.f32 %v884_v37  ;;  %953 = vmatprep.subr.bf16.mxu0 %v931_v45  ;;  %v932_v55 = vpack.c.bf16 %v1380_v31, %v1386_v47  ;;  %v817_v30 = vadd.f32 %v1838_v4, %v1820_v34  ;;  %v1108_v32 = vpop.permute.xlu0 %1107 }
 0x200   : > { %v1390_v56 = vpop.eup %1389  ;;  %1413 = vtanh.f32 %v833_v48  ;;  %994 = vmatprep.subr.bf16.mxu1 %v933_v51  ;;  %954 = vmatpush1.bf16.msra.mxu0 %v930_v46  ;;  %v1112_v28 = vsub.s32 0, %v1111_v25  ;;  %v1135_v35 = vunpack.c.l.s4 %v1526_v33 }
 0x201   : > { %v1392_v59 = vpop.eup %1391  ;;  %1415 = vtanh.f32 %v886_v49  ;;  %995 = vmatpush1.bf16.msra.mxu1 %v932_v55  ;;  %955 = vmatprep.subr.bf16.mxu0 %v923_v29 }
 0x202   : > { %v1394_v60 = vpop.eup %1393  ;;  %1417 = vtanh.f32 %v880_v39  ;;  %996 = vmatprep.subr.bf16.mxu1 %v925_v58  ;;  %v922_v62 = vpack.c.bf16 %v1388_v53, %v1392_v59  ;;  %v1113_v36 = vrot.slane %v1108_v32, %v1112_v28  ;;  %v1136_v37 = vunpack.c.0.s8 %v1135_v35 }
 0x203   : > { %1419 = vtanh.f32 %v821_v54  ;;  %v924_v40 = vpack.c.bf16 %v1390_v56, %v1394_v60  ;;  %v1396_v63 = vpop.eup %1395 }
 0x204   : > { %1421 = vtanh.f32 %v874_v57  ;;  %956 = vmatpush1.bf16.msra.mxu0 %v922_v62  ;;  %v1398_v2 = vpop.eup %1397  ;;  %v1139_v45 = vsub.s32 %v1136_v37, %v1111_v25 }
 0x205   : > { %1423 = vtanh.f32 %v817_v30  ;;  %997 = vmatpush1.bf16.msra.mxu1 %v924_v40  ;;  %v1400_v3 = vpop.eup %1399 }
 0x206   : > { %1425 = vtanh.f32 %v870_v61  ;;  %v1402_v4 = vpop.eup %1401  ;;  %v927_v17 = vpack.c.bf16 %v1400_v3, %v1396_v63 }
 0x207   : > { %1295 = vmatmul.mubr.msk.bf16.vlgmr.msra.gmra.mxu0 %vm669_vm1, %v920_v0  ;;  %v1404_v34 = vpop.eup %1403  ;;  %v929_v52 = vpack.c.bf16 %v1402_v4, %v1398_v2 }
 0x208   : > { %1296 = vmatmul.mubr.msk.bf16.vlgmr.msra.gmra.mxu1 %vm669_vm1, %v920_v0  ;;  %1055 = vmatprep.mubr.bf16.mxu0 %v1525_v1 }
 0x209   : > { %v1406_v5 = vpop.eup %1405  ;;  %1096 = vmatprep.mubr.bf16.mxu1 %v1525_v1 }
 0x20a   : > { %v1408_v6 = vpop.eup %1407 }
 0x20b   : > { %v1410_v7 = vpop.eup %1409 }
 0x20c   : > { %v1412_v8 = vpop.eup %1411  ;;  %v934_v13 = vpack.c.bf16 %v1410_v7, %v1404_v34 }
 0x20d   : > { %v1414_v9 = vpop.eup %1413 }
 0x20e   : > { %v1416_v10 = vpop.eup %1415  ;;  %v935_v42 = vpack.c.bf16 %v1414_v9, %v1406_v5 }
 0x20f   : > { %v1418_v11 = vpop.eup %1417  ;;  %v937_v12 = vpack.c.bf16 %v1416_v10, %v1408_v6 }
 0x210   : > { %v1420_v14 = vpop.eup %1419  ;;  %1035 = vmatprep.subr.bf16.mxu0 %v935_v42  ;;  %v936_v16 = vpack.c.bf16 %v1412_v8, %v1418_v11 }
 0x211   : > { %v1422_v18 = vpop.eup %1421  ;;  %1076 = vmatprep.subr.bf16.mxu1 %v937_v12  ;;  %1036 = vmatpush1.bf16.msra.mxu0 %v934_v13 }
 0x212   : > { %v1424_v19 = vpop.eup %1423  ;;  %1077 = vmatpush1.bf16.msra.mxu1 %v936_v16  ;;  %1037 = vmatprep.subr.bf16.mxu0 %v927_v17 }
 0x213   : > { %v1426_v1 = vpop.eup %1425  ;;  %1078 = vmatprep.subr.bf16.mxu1 %v929_v52  ;;  %v926_v50 = vpack.c.bf16 %v1420_v14, %v1424_v19 }
 0x214   : > { %v928_v20 = vpack.c.bf16 %v1422_v18, %v1426_v1 }
 0x215   : > { %1038 = vmatpush1.bf16.msra.mxu0 %v926_v50 }
 0x216   : > { %1079 = vmatpush1.bf16.msra.mxu1 %v928_v20 }
 0x218   : > { %1297 = vmatmul.mubr.msk.bf16.vlgmr.msra.gmra.mxu0 %vm669_vm1, %v920_v0 }
 0x219   : > { %1298 = vmatmul.mubr.msk.bf16.vlgmr.msra.gmra.mxu1 %vm669_vm1, %v920_v0 }
 0x2c7   : > { %v975_v22 = vpop.f32.mrf.mxu0 }
 0x2c8   : > { %v1016_v23 = vpop.f32.mrf.mxu1  ;;  %v1114_v41 = vadd.f32 %v1113_v36, %v975_v22 }
 0x2c9   : > { %v977_v24 = vpop.f32.mrf.mxu0  ;;  %v1116_v43 = vadd.f32 %v1113_v36, %v1016_v23 }
 0x2ca   : > { %v1018_v26 = vpop.f32.mrf.mxu1  ;;  %v1115_v38 = vadd.f32 %v1113_v36, %v977_v24 }
 0x2cb   : > { %v979_v27 = vpop.f32.mrf.mxu0  ;;  %v1117_v39 = vadd.f32 %v1113_v36, %v1018_v26 }
 0x2cc   : > { %v1020_v44 = vpop.f32.mrf.mxu1  ;;  %v1130_v46 = vcombine.low %v1114_v41, %v1115_v38 }
 0x2cd   : > { %v980_v15 = vpop.f32.mrf.mxu0  ;;  %v1131_v47 = vcombine.low %v1116_v43, %v1117_v39 }
 0x2ce   : > { %v1021_v31 = vpop.f32.mrf.mxu1  ;;  %v1140_v29 = vrot.slane %v1130_v46, %v1139_v45 }
 0x2cf   : > { %v1147_v56 = vrot.slane %v1131_v47, %v1139_v45 }
 0x2d1   : > { %v1162_v0 = vcombine.low %v1140_v29, %v1147_v56 }
 0x2d3   : > { %v1170_v4 = vrot.slane %v1162_v0, %v1139_v45 }
 0x2d8   : > { %v1057_v48 = vpop.f32.mrf.mxu0 }
 0x2d9   : > { %v1098_v49 = vpop.f32.mrf.mxu1  ;;  %v1118_v53 = vadd.f32 %v1113_v36, %v1057_v48 }
 0x2da   : > { %v1059_v51 = vpop.f32.mrf.mxu0  ;;  %v1120_v57 = vadd.f32 %v1113_v36, %v1098_v49 }
 0x2db   : > { %v1119_v54 = vadd.f32 %v1113_v36, %v1059_v51  ;;  %v1100_v55 = vpop.f32.mrf.mxu1 }
 0x2dc   : > { %v1121_v58 = vadd.f32 %v1113_v36, %v1100_v55  ;;  %v1061_v59 = vpop.f32.mrf.mxu0 }
 0x2dd   : > { %v1132_v30 = vcombine.low %v1118_v53, %v1119_v54  ;;  %v1102_v60 = vpop.f32.mrf.mxu1 }
 0x2de   : > { %v1133_v61 = vcombine.low %v1120_v57, %v1121_v58  ;;  %v1062_v62 = vpop.f32.mrf.mxu0 }
 0x2df   : > { %v1154_v40 = vrot.slane %v1132_v30, %v1139_v45  ;;  %v1103_v63 = vpop.f32.mrf.mxu1 }
 0x2e0   : > { %v1161_v2 = vrot.slane %v1133_v61, %v1139_v45 }
 0x2e2   : > { %v1163_v3 = vcombine.low %v1154_v40, %v1161_v2 }
 0x2e4   : > { %v1177_v34 = vrot.slane %v1163_v3, %v1139_v45 }
 0x2e6   : > { %v1178_v5 = vcombine.low %v1170_v4, %v1177_v34 }
 0x2e8   : > { %1180 = vst [vmem:[%s298_s13] sm:$0xff] %v1178_v5 }
 0x2e9   : > { %1468 = shalt.err (!%p1465_p9)
}
 0x2ea   : > { %s1469_s9 = scalar_lea.hbm %s1194_s25, 128  ;;  %s1473_s17 = scalar_lea.hbm %s1919_s7, 512 }
 0x2eb   : > { %p1470_p0 = scmp.ne.s32.totalorder %s1194_s25, %s1469_s9  ;;  %p1474_p1 = scmp.lt.s32.totalorder %s1194_s25, %s1919_s7 }
 0x2ec   : > { %p1475_p3 = scmp.lt.s32.totalorder %s1473_s17, %s1469_s9 }
 0x2ed   : > { %p1471_p2 = pnand %p1470_p0, %p1929_p11 }
 0x2ee   : > { %p1476_p6 = por %p1475_p3, %p1474_p1 }
 0x2ef   : > { %p1472_p13 = pneg %p1471_p2 }
 0x2f1   : > { %p1477_p10 = pnand %p1476_p6, %p1472_p13 }
 0x2f3   : > { %1480 = shalt.err (!%p1477_p10)
}
 0x2f4   : > { %1308 = dma.vmem_to_hbm [thread:$0]  (%p1929_p11), %s1197_s21, 128, %s1194_s25, %s1182_s19  }
 0x2f5 PF: > { %p1319_p12 = scmp.ge.s32.totalorder %s1519_s29, 2  ;;  %s1208_s13 = sand.u32 1, %s1507_s26  }
 0x2f6   : > { %p1930_p4 = scmp.ne.s32.totalorder %s1925_s15, 0  ;;  %s1209_s23 = scalar_lea.sflag [#allocation5], %s1208_s13 }
 0x2f8   : > { %p1315_p5 = pnand %p1319_p12, %p1930_p4 }
 0x2fa   : > { %p1316_p7 = pneg %p1315_p5 }
 0x2fc   : > { %1502 = dma.done.wait (%p1316_p7), %s1209_s23, 128  }
 0x2fd   : > { %1504 = vsyncadd (%p1316_p7), %s1209_s23, 4294967168  ;;  %p22_p8 = scmp.ge.s32.totalorder %s1596_s8, 6   ;;  %s1931_s26 = smov %s1511_s27 }
 0x2fe   : > { %s1932_s27 = smov %s1515_s28  ;;  %s1933_s28 = smov %s1608_s11 }
 0x2ff   : > { %s1934_s29 = smov %s1596_s8  ;;  %24 = sbr.rel (!%p22_p8) target bundleno = 8 (0x8), region = 93 }
 0x304   :  { %1214 = vsyncpa [#allocation4], 1 }
 0x305   :  { %1216 = vsyncpa [#allocation4 + $0x1], 1 }
 0x306   :  { %1217 = vsyncpa [#allocation5], 1 }
 0x307   :  { %1219 = vsyncpa [#allocation5 + $0x1], 1 }

</bundles_post_ra>
